<compile_context>
chip_gen: v6e
topology: v6e:2x2x1
jax: 0.10.0
libtpu: 0.0.40
codegen_flags: <defaults>
</compile_context>

<pallas_src>
import functools

import jax
import jax.numpy as jnp
from jax import lax
from jax.experimental import pallas as pl
from jax.experimental.pallas import tpu as pltpu

LANES = 128
SUBLANES = 8
MAX_BLOCK_ROWS = 1024  # (1024,128) f32 block -> 2 inputs x 2 buffers x 512 KiB = 2 MiB


def _sublane_multiple(dtype):
    # f32 -> 8 rows, bf16 -> 16, int8/fp8 -> 32 (packed-sublane tiling).
    return max(SUBLANES, 32 // jnp.dtype(dtype).itemsize)


def _num_tensorcores():
    # v7x exposes 2 TensorCores per chip; v5e/v6e have a single TC, where a
    # core axis is just a serial loop (and can add a duplicated masked tile).
    try:
        kind = jax.devices()[0].device_kind.lower()
    except Exception:
        return 1
    if "v7" in kind or "7x" in kind:
        return 2
    return 1


def _loss_elems(xv, yv, alpha):
    # Numerically stable reformulation of
    #   -(1-y)*log(1-sigmoid(x)) - alpha*y*log(sigmoid(x))
    # = (1-y)*softplus(x) + alpha*y*softplus(-x),
    # softplus(z) = max(z,0) + log1p(exp(-|z|));  softplus(-x) = softplus(x) - x.
    # Folded:   alpha == 1 : softplus(x) - y*x
    #           general   : softplus(x)*(1 + (alpha-1)*y) - alpha*(y*x)
    xv = xv.astype(jnp.float32)
    yv = yv.astype(jnp.float32)
    sp = jnp.maximum(xv, 0.0) + jnp.log1p(jnp.exp(-jnp.abs(xv)))
    if alpha == 1.0:
        return sp - yv * xv
    return sp * (1.0 + (alpha - 1.0) * yv) - alpha * (yv * xv)


def _soft_label_ordinal_kernel(
    n_ref, x_ref, y_ref, o_ref, *, alpha, block_rows, tiles_per_core, two_axes
):
    if two_axes:
        c = pl.program_id(0)  # core axis (CORE_PARALLEL on v7x)
        i = pl.program_id(1)  # reduction axis
    else:
        c = 0
        i = pl.program_id(0)

    @pl.when(i == 0)
    def _():
        o_ref[...] = jnp.zeros_like(o_ref)

    loss = _loss_elems(x_ref[...], y_ref[...], alpha)

    block_elems = block_rows * LANES
    t = c * tiles_per_core + i               # global (unclamped) tile index
    remaining = n_ref[0] - t * block_elems   # scalar valid-element count in this tile
    needs_mask = remaining < block_elems

    def accumulate(vals):
        # (block_rows,128) -> (block_rows//8, 8, 128); axis-0 sum is pure
        # vreg-wise VPU adds into the resident (8,128) output accumulator.
        o_ref[...] += jnp.sum(
            vals.reshape(block_rows // SUBLANES, SUBLANES, LANES), axis=0
        )

    @pl.when(jnp.logical_not(needs_mask))
    def _():
        accumulate(loss)

    @pl.when(needs_mask)
    def _():
        # Only tail / duplicated-clamped tiles pay the iota + compare + select.
        local_idx = (
            lax.broadcasted_iota(jnp.int32, (block_rows, LANES), 0) * LANES
            + lax.broadcasted_iota(jnp.int32, (block_rows, LANES), 1)
        )
        accumulate(jnp.where(local_idx < remaining, loss, 0.0))


@functools.partial(jax.jit, static_argnames=("alpha",))
def soft_label_ordinal_loss(x, y, alpha=1.0):
    """Pallas implementation of SoftLabelOrdinalLoss.forward -> scalar f32."""
    assert x.shape == y.shape, "x and y must have identical shapes"
    alpha = float(alpha)
    n = int(x.size)
    # TODO(synk): tile indexing is int32; inputs approaching 2**31 elements
    # would need a 64-bit or chunked index scheme.

    xf = jnp.ravel(x)
    yf = jnp.ravel(y)

    mult = max(_sublane_multiple(x.dtype), _sublane_multiple(y.dtype))
    granule = mult * LANES
    n_aligned = (n // granule) * granule  # kernel consumes only the aligned prefix

    total = jnp.float32(0.0)

    if n_aligned < n:
        # Ragged tail (< mult*128 elements) in plain JAX: avoids a full-array
        # jnp.pad (extra HBM read+write of BOTH inputs) before the kernel.
        total = total + jnp.sum(_loss_elems(xf[n_aligned:], yf[n_aligned:], alpha))

    if n_aligned > 0:
        rows = n_aligned // LANES  # multiple of `mult`
        x2 = xf[:n_aligned].reshape(rows, LANES)
        y2 = yf[:n_aligned].reshape(rows, LANES)

        num_cores = _num_tensorcores()
        block_rows = min(
            MAX_BLOCK_ROWS, pl.cdiv(pl.cdiv(rows, num_cores), mult) * mult
        )
        total_tiles = pl.cdiv(rows, block_rows)

        two_axes = num_cores > 1 and total_tiles >= num_cores
        if two_axes:
            tiles_per_core = pl.cdiv(total_tiles, num_cores)
            grid = (num_cores, tiles_per_core)
            out_cores = num_cores

            def in_map(c, i, n_sm):
                # Clamp duplicated / out-of-range tiles; fully masked in-kernel.
                return (jnp.minimum(c * tiles_per_core + i, total_tiles - 1), 0)

            out_map = lambda c, i, n_sm: (c, 0, 0)
            dim_sems = (pltpu.CORE_PARALLEL, pltpu.ARBITRARY)
        else:
            tiles_per_core = total_tiles
            grid = (total_tiles,)
            out_cores = 1

            def in_map(i, n_sm):
                return (i, 0)

            out_map = lambda i, n_sm: (0, 0, 0)
            dim_sems = (pltpu.ARBITRARY,)

        kernel = functools.partial(
            _soft_label_ordinal_kernel,
            alpha=alpha,
            block_rows=block_rows,
            tiles_per_core=tiles_per_core,
            two_axes=two_axes,
        )

        n_arr = jnp.array([n_aligned], dtype=jnp.int32)

        partials = pl.pallas_call(
            kernel,
            out_shape=jax.ShapeDtypeStruct((out_cores, SUBLANES, LANES), jnp.float32),
            grid_spec=pltpu.PrefetchScalarGridSpec(
                num_scalar_prefetch=1,
                grid=grid,
                in_specs=[
                    pl.BlockSpec((block_rows, LANES), in_map),
                    pl.BlockSpec((block_rows, LANES), in_map),
                ],
                out_specs=pl.BlockSpec((None, SUBLANES, LANES), out_map),
            ),
            compiler_params=pltpu.CompilerParams(
                dimension_semantics=dim_sems,
            ),
        )(n_arr, x2, y2)

        total = total + jnp.sum(partials)

    return total / jnp.float32(n)


def _reference(x, y, alpha=1.0):
    s = jax.nn.sigmoid(x.astype(jnp.float32))
    y = y.astype(jnp.float32)
    soft_loss = -(1.0 - y) * jnp.log(1.0 - s) - alpha * y * jnp.log(s)
    return jnp.mean(soft_loss)


if __name__ == "__main__":
    key = jax.random.PRNGKey(0)
    kx, ky = jax.random.split(key)

    # x: raw logits; y: soft ordinal labels in [0, 1]
    x = jax.random.normal(kx, (2, 4, 16, 16), dtype=jnp.float32)
    y = jax.random.uniform(ky, (2, 4, 16, 16), dtype=jnp.float32)

    loss = soft_label_ordinal_loss(x, y, alpha=1.0)
    loss = jax.block_until_ready(loss)
    ref = _reference(x, y, alpha=1.0)
    assert jnp.allclose(loss, ref, rtol=1e-5, atol=1e-5), (loss, ref)

    # Non-aligned shape: exercises aligned-prefix kernel + ragged-tail path.
    kx2, ky2 = jax.random.split(ky)
    x3 = jax.random.normal(kx2, (5, 300), dtype=jnp.float32)
    y3 = jax.random.uniform(ky2, (5, 300), dtype=jnp.float32)
    loss3 = jax.block_until_ready(soft_label_ordinal_loss(x3, y3, alpha=1.0))
    ref3 = _reference(x3, y3, alpha=1.0)
    assert jnp.allclose(loss3, ref3, rtol=1e-5, atol=1e-5), (loss3, ref3)

    # General alpha branch.
    loss_a = jax.block_until_ready(soft_label_ordinal_loss(x, y, alpha=2.0))
    ref_a = _reference(x, y, alpha=2.0)
    assert jnp.allclose(loss_a, ref_a, rtol=1e-5, atol=1e-5), (loss_a, ref_a)

    print("KERNEL_OK")
</pallas_src>

<mosaic_0001>
module attributes {stable_mosaic.version = 11 : i64} {
  func.func @_soft_label_ordinal_kernel(%arg0: i32, %arg1: memref<1xi32, #tpu.memory_space<smem>>, %arg2: memref<16x128xf32, #tpu.memory_space<vmem>>, %arg3: memref<16x128xf32, #tpu.memory_space<vmem>>, %arg4: memref<1x8x128xf32, #tpu.memory_space<vmem>>) attributes {dimension_semantics = [#tpu.dimension_semantics<arbitrary>], iteration_bounds = array<i64: 1>, scalar_prefetch = 1 : i64, scratch_operands = 0 : i64, tpu.core_type = #tpu.core_type<tc>, window_params = [{transform_indices = @transform_0, window_bounds = array<i64: 16, 128>}, {transform_indices = @transform_1, window_bounds = array<i64: 16, 128>}, {pipeline_mode = #tpu.pipeline_mode<synchronous>, transform_indices = @transform_2, window_bounds = array<i64: 1, 8, 128>}]} {
    %c0_i32 = arith.constant 0 : i32
    %0 = arith.cmpi eq, %arg0, %c0_i32 : i32
    %1 = arith.extui %0 : i1 to i32
    %c0_i32_0 = arith.constant 0 : i32
    %2 = arith.cmpi ne, %1, %c0_i32_0 : i32
    scf.if %2 {
      %cst_10 = arith.constant 0.000000e+00 : f32
      %25 = vector.broadcast %cst_10 : f32 to vector<8x128xf32>
      %c0_11 = arith.constant 0 : index
      %c0_12 = arith.constant 0 : index
      %c0_13 = arith.constant 0 : index
      %26 = vector.load %arg4[%c0_11, %c0_12, %c0_13] : memref<1x8x128xf32, #tpu.memory_space<vmem>>, vector<1x8x128xf32>
      %27 = vector.shape_cast %26 : vector<1x8x128xf32> to vector<8x128xf32>
      %28 = vector.shape_cast %25 : vector<8x128xf32> to vector<1x8x128xf32>
      tpu.vector_store %arg4[%c0_11, %c0_12, %c0_13], %28 {strides = array<i32>} : memref<1x8x128xf32, #tpu.memory_space<vmem>>, vector<1x8x128xf32>,
    } else {
    }
    %c0 = arith.constant 0 : index
    %c0_1 = arith.constant 0 : index
    %3 = vector.load %arg2[%c0, %c0_1] : memref<16x128xf32, #tpu.memory_space<vmem>>, vector<16x128xf32>
    %c0_2 = arith.constant 0 : index
    %c0_3 = arith.constant 0 : index
    %4 = vector.load %arg3[%c0_2, %c0_3] : memref<16x128xf32, #tpu.memory_space<vmem>>, vector<16x128xf32>
    %cst = arith.constant 0.000000e+00 : f32
    %5 = vector.broadcast %cst : f32 to vector<16x128xf32>
    %6 = arith.maximumf %3, %5 : vector<16x128xf32>
    %7 = math.absf %3 : vector<16x128xf32>
    %cst_4 = arith.constant 0.000000e+00 : f32
    %8 = vector.broadcast %cst_4 : f32 to vector<16x128xf32>
    %9 = arith.subf %8, %7 : vector<16x128xf32>
    %10 = math.exp %9 : vector<16x128xf32>
    %11 = math.log1p %10 : vector<16x128xf32>
    %12 = arith.addf %6, %11 : vector<16x128xf32>
    %13 = arith.mulf %4, %3 : vector<16x128xf32>
    %14 = arith.subf %12, %13 : vector<16x128xf32>
    %c0_i32_5 = arith.constant 0 : i32
    %15 = arith.addi %c0_i32_5, %arg0 : i32
    %c0_6 = arith.constant 0 : index
    %16 = memref.load %arg1[%c0_6] : memref<1xi32, #tpu.memory_space<smem>>
    %c2048_i32 = arith.constant 2048 : i32
    %17 = arith.muli %15, %c2048_i32 : i32
    %18 = arith.subi %16, %17 : i32
    %c2048_i32_7 = arith.constant 2048 : i32
    %19 = arith.cmpi slt, %18, %c2048_i32_7 : i32
    %true = arith.constant true
    %20 = arith.xori %19, %true : i1
    %21 = arith.extui %20 : i1 to i32
    %c0_i32_8 = arith.constant 0 : i32
    %22 = arith.cmpi ne, %21, %c0_i32_8 : i32
    scf.if %22 {
      %c0_10 = arith.constant 0 : index
      %c0_11 = arith.constant 0 : index
      %c0_12 = arith.constant 0 : index
      %25 = vector.load %arg4[%c0_10, %c0_11, %c0_12] : memref<1x8x128xf32, #tpu.memory_space<vmem>>, vector<1x8x128xf32>
      %26 = vector.shape_cast %25 : vector<1x8x128xf32> to vector<8x128xf32>
      %27 = vector.shape_cast %14 : vector<16x128xf32> to vector<2x8x128xf32>
      %cst_13 = arith.constant dense<0.000000e+00> : vector<8x128xf32>
      %28 = vector.multi_reduction <add>, %27, %cst_13 [0] : vector<2x8x128xf32> to vector<8x128xf32>
      %29 = arith.addf %26, %28 : vector<8x128xf32>
      %c0_14 = arith.constant 0 : index
      %c0_15 = arith.constant 0 : index
      %c0_16 = arith.constant 0 : index
      %30 = vector.load %arg4[%c0_14, %c0_15, %c0_16] : memref<1x8x128xf32, #tpu.memory_space<vmem>>, vector<1x8x128xf32>
      %31 = vector.shape_cast %30 : vector<1x8x128xf32> to vector<8x128xf32>
      %32 = vector.shape_cast %29 : vector<8x128xf32> to vector<1x8x128xf32>
      tpu.vector_store %arg4[%c0_14, %c0_15, %c0_16], %32 {strides = array<i32>} : memref<1x8x128xf32, #tpu.memory_space<vmem>>, vector<1x8x128xf32>,
    } else {
    }
    %23 = arith.extui %19 : i1 to i32
    %c0_i32_9 = arith.constant 0 : i32
    %24 = arith.cmpi ne, %23, %c0_i32_9 : i32
    scf.if %24 {
      %25 = tpu.iota {dimensions = array<i32: 0>} : vector<16x128xi32>
      %c128_i32 = arith.constant 128 : i32
      %26 = vector.broadcast %c128_i32 : i32 to vector<16x128xi32>
      %27 = arith.muli %25, %26 : vector<16x128xi32>
      %28 = tpu.iota {dimensions = array<i32: 1>} : vector<16x128xi32>
      %29 = arith.addi %27, %28 : vector<16x128xi32>
      %30 = vector.broadcast %18 : i32 to vector<16x128xi32>
      %31 = arith.cmpi slt, %29, %30 : vector<16x128xi32>
      %cst_10 = arith.constant 0.000000e+00 : f32
      %32 = vector.broadcast %cst_10 : f32 to vector<16x128xf32>
      %33 = arith.select %31, %14, %32 : vector<16x128xi1>, vector<16x128xf32>
      %c0_11 = arith.constant 0 : index
      %c0_12 = arith.constant 0 : index
      %c0_13 = arith.constant 0 : index
      %34 = vector.load %arg4[%c0_11, %c0_12, %c0_13] : memref<1x8x128xf32, #tpu.memory_space<vmem>>, vector<1x8x128xf32>
      %35 = vector.shape_cast %34 : vector<1x8x128xf32> to vector<8x128xf32>
      %36 = vector.shape_cast %33 : vector<16x128xf32> to vector<2x8x128xf32>
      %cst_14 = arith.constant dense<0.000000e+00> : vector<8x128xf32>
      %37 = vector.multi_reduction <add>, %36, %cst_14 [0] : vector<2x8x128xf32> to vector<8x128xf32>
      %38 = arith.addf %35, %37 : vector<8x128xf32>
      %c0_15 = arith.constant 0 : index
      %c0_16 = arith.constant 0 : index
      %c0_17 = arith.constant 0 : index
      %39 = vector.load %arg4[%c0_15, %c0_16, %c0_17] : memref<1x8x128xf32, #tpu.memory_space<vmem>>, vector<1x8x128xf32>
      %40 = vector.shape_cast %39 : vector<1x8x128xf32> to vector<8x128xf32>
      %41 = vector.shape_cast %38 : vector<8x128xf32> to vector<1x8x128xf32>
      tpu.vector_store %arg4[%c0_15, %c0_16, %c0_17], %41 {strides = array<i32>} : memref<1x8x128xf32, #tpu.memory_space<vmem>>, vector<1x8x128xf32>,
    } else {
    }
    return
  }
  func.func @transform_0(%arg0: i32, %arg1: memref<1xi32, #tpu.memory_space<smem>>) -> (i32, i32) {
    %c0_i32 = arith.constant 0 : i32
    %c0_i32_0 = arith.constant 0 : i32
    return %arg0, %c0_i32 : i32, i32
  }
  func.func @transform_1(%arg0: i32, %arg1: memref<1xi32, #tpu.memory_space<smem>>) -> (i32, i32) {
    %c0_i32 = arith.constant 0 : i32
    %c0_i32_0 = arith.constant 0 : i32
    return %arg0, %c0_i32 : i32, i32
  }
  func.func @transform_2(%arg0: i32, %arg1: memref<1xi32, #tpu.memory_space<smem>>) -> (i32, i32, i32) {
    %c0_i32 = arith.constant 0 : i32
    %c0_i32_0 = arith.constant 0 : i32
    %c0_i32_1 = arith.constant 0 : i32
    %c0_i32_2 = arith.constant 0 : i32
    return %c0_i32, %c0_i32_0, %c0_i32_1 : i32, i32, i32
  }
}

</mosaic_0001>

<bundles_post_ra>
// kernel: soft_label_ordinal_loss.1
= control target key start
LH: loop header
LB: loop body
LE: loop exit
PB: predicated region body
PF: predicated region fallthrough
CT: control target
= control target key end

     0   :  { %v104_v0 = vmov 0.0   ;;  %s161_s0 = inlined_call_operand.<no memory space> [shape: s32[1], index: 0, kind: input, shape index: {}]   ;;  %s162_s1 = inlined_call_operand.vmem [shape: f32[16,128], index: 1, kind: input, shape index: {}]   ;;  %s163_s3 = inlined_call_operand.vmem [shape: f32[1,8,128], index: 3, kind: output, shape index: {}]   ;;  %s164_s2 = inlined_call_operand.vmem [shape: f32[16,128], index: 2, kind: input, shape index: {}]  }
   0x1   :  { %17 = vst [vmem:[%s163_s3] sm:$0xff] %v104_v0  ;;  %v18_v1 = vld [vmem:[%s162_s1] sm:$0xff]  ;;  %v19_v2 = vld [vmem:[%s162_s1 + $0x8] sm:$0xff]  ;;  %p93_p0 = scmp.lt.s32.totalorder %s161_s0, 2048 }
   0x2   :  { %v24_v3 = vand.u32 2147483647, %v18_v1  ;;  %v25_v4 = vand.u32 2147483647, %v19_v2  ;;  %v20_v19 = vld [vmem:[%s164_s2] sm:$0xff]  ;;  %v21_v22 = vld [vmem:[%s164_s2 + $0x8] sm:$0xff] }
   0x3   :  { %v22_v23 = vmax.f32 %v18_v1, 0.0  ;;  %v23_v26 = vmax.f32 %v19_v2, 0.0  ;;  %v52_v29 = vmul.f32 %v20_v19, %v18_v1  ;;  %v53_v31 = vmul.f32 %v21_v22, %v19_v2 }
   0x4   :  { %v26_v5 = vsub.f32 0.0, %v24_v3  ;;  %v27_v6 = vsub.f32 0.0, %v25_v4 }
   0x6   :  { %v28_v7 = vmul.f32 1.442695, %v26_v5  ;;  %v30_v8 = vmul.f32 1.442695, %v27_v6 }
   0x8   :  { %96 = vpow2.f32 %v28_v7 }
   0x9   :  { %98 = vpow2.f32 %v30_v8 }
  0x15   :  { %v97_v9 = vpop.eup %96 }
  0x16   :  { %v99_v10 = vpop.eup %98  ;;  %v32_v11 = vadd.f32 1.0, %v97_v9  ;;  %v35_v13 = vmul.f32 -0.5, %v97_v9  ;;  %v38_v16 = vand.u32 2147483647, %v97_v9 }
  0x17   :  { %v41_v12 = vadd.f32 1.0, %v99_v10  ;;  %v44_v14 = vmul.f32 -0.5, %v99_v10  ;;  %v47_v18 = vand.u32 2147483647, %v99_v10 }
  0x18   :  { %100 = vlog2.f32 %v32_v11  ;;  %v36_v15 = vadd.f32 1.0, %v35_v13  ;;  %vm39_vm0 = vcmp.lt.f32.partialorder %v38_v16, 0.0004427343 }
  0x19   :  { %102 = vlog2.f32 %v41_v12  ;;  %v45_v17 = vadd.f32 1.0, %v44_v14  ;;  %vm48_vm1 = vcmp.lt.f32.partialorder %v47_v18, 0.0004427343 }
  0x1a   :  { %v37_v20 = vmul.f32 %v97_v9, %v36_v15 }
  0x1b   :  { %v46_v24 = vmul.f32 %v99_v10, %v45_v17 }
  0x25   :  { %v101_v21 = vpop.eup %100 }
  0x26   :  { %v103_v25 = vpop.eup %102  ;;  %v34_v27 = vmul.f32 0.6931472, %v101_v21 }
  0x27   :  { %v43_v28 = vmul.f32 0.6931472, %v103_v25 }
  0x28   :  { %v40_v30 = vsel %vm39_vm0, %v37_v20, %v34_v27  ;;  %63 = sbr.rel (%p93_p0) target bundleno = 51 (0x33), region = 17 }
  0x29   :  { %v49_v32 = vsel %vm48_vm1, %v46_v24, %v43_v28  ;;  %v50_v33 = vadd.f32 %v40_v30, %v22_v23 }
  0x2a   :  { %v51_v34 = vadd.f32 %v49_v32, %v23_v26 }
  0x2b   :  { %v54_v35 = vsub.f32 %v50_v33, %v52_v29 }
  0x2c   :  { %v55_v36 = vsub.f32 %v51_v34, %v53_v31 }
  0x2d   :  { %v64_v37 = vld [vmem:[%s163_s3] sm:$0xff] }
  0x2e   :  { %v65_v38 = vadd.f32 %v55_v36, %v54_v35 }
  0x30   :  { %v66_v39 = vadd.f32 %v65_v38, %v64_v37 }
  0x32   :  { %67 = vst [vmem:[%s163_s3] sm:$0xff] %v66_v39 }
  0x33 PF:  { %p94_p1 = scmp.ge.s32.totalorder %s161_s0, 2048 }
  0x35   :  { %70 = sbr.rel (%p94_p1) target bundleno = 75 (0x4b), region = 21 }
  0x3a   :  { %v71_v40 = vlaneseq  ;;  %v80_v45 = vstv %s161_s0  ;;  %v85_v51 = vld [vmem:[%s163_s3] sm:$0xff] }
  0x3c   :  { %v72_v41 = vshrl.u32 %v71_v40, 7  ;;  %v77_v42 = vand.u32 127, %v71_v40 }
  0x3e   :  { %v73_v43 = vadd.s32 8, %v72_v41  ;;  %v74_v44 = vmul.u32 128, %v72_v41 }
  0x40   :  { %v75_v46 = vmul.u32 128, %v73_v43  ;;  %v78_v47 = vadd.s32 %v77_v42, %v74_v44 }
  0x42   :  { %v79_v48 = vadd.s32 %v77_v42, %v75_v46  ;;  %vm81_vm2 = vcmp.lt.s32.totalorder %v78_v47, %v80_v45 }
  0x43   :  { %v83_v49 = vsel %vm81_vm2, %v54_v35, 0.0 }
  0x44   :  { %vm82_vm3 = vcmp.lt.s32.totalorder %v79_v48, %v80_v45 }
  0x45   :  { %v84_v50 = vsel %vm82_vm3, %v55_v36, 0.0 }
  0x46   :  { %v86_v52 = vadd.f32 %v84_v50, %v83_v49 }
  0x48   :  { %v87_v53 = vadd.f32 %v86_v52, %v85_v51 }
  0x4a   :  { %88 = vst [vmem:[%s163_s3] sm:$0xff] %v87_v53 }
  0x4b PF:  {}

</bundles_post_ra>
